<compile_context>
chip_gen: v5e
topology: v5e:2x2
jax: 0.10.0
libtpu: 0.0.40
codegen_flags: <defaults>
</compile_context>

<pallas_src>
import functools

import jax
import jax.numpy as jnp
import numpy as np
from jax.experimental import pallas as pl
from jax.experimental.pallas import tpu as pltpu


def _round_up(x: int, m: int) -> int:
    return ((x + m - 1) // m) * m


def _choose_tb(batch: int, p_pad: int, target_rows: int) -> int:
    """Batch-tile size.

    Aims for ~target_rows projected rows per tile (big tiles amortize the
    ~0.35us/grid-step overhead and keep the projection matmul M-wide), but
    keeps the grid at >= 2 steps whenever the batch allows it so the
    "parallel" axis can shard across v7x's two TensorCores.  The output block
    is (tb, T_pad): multi-tile => tb must be a multiple of 8; single-tile =>
    tb == (padded) batch is allowed.
    """
    tb = max(1, target_rows // p_pad)
    if batch >= 16:                       # enough rows for two >=8-row tiles
        tb = min(tb, max(8, (batch // 2) // 8 * 8))
    if tb >= batch:
        return batch                      # one tile over the whole batch
    return max(8, _round_up(tb, 8))       # multi-tile: sublane-aligned rows


# ---------- Fused kernel: project + L2-normalize + similarity + softmax-pool --
def _fused_unmix_kernel(x_ref, w_ref, b_ref, txt_ref, o_ref, *, tb, p_pad, p):
    # x:   [tb, p_pad, D] bf16 patch features (patch axis zero-padded)
    # w:   [D, C]         bf16 image projector weight (VMEM-resident)
    # b:   [1, C]         f32  image projector bias   (VMEM-resident)
    # txt: [C, T_pad]     bf16 (20 * L2-normalized txt_proj)^T, zero-padded on T
    # o:   [tb, T_pad]    f32  pooled logits tile (lane-dense store)
    d = x_ref.shape[-1]
    x = x_ref[...].reshape(tb * p_pad, d)      # layout-free: p_pad % 8 == 0

    # Projection: bf16 MXU operands, f32 accumulation; bias add in f32.
    y = jnp.dot(x, w_ref[...], preferred_element_type=jnp.float32) + b_ref[...]

    # L2-normalization factor, applied AFTER the similarity matmul (row scaling
    # commutes through the matmul), so the normalized [rows, C] activations are
    # never materialized.  rsqrt(max(ss, 1e-24)) == 1 / max(||y||, 1e-12),
    # matching torch.nn.functional.normalize(eps=1e-12).  Exact rsqrt (EUP).
    inv = jax.lax.rsqrt(
        jnp.maximum(jnp.sum(y * y, axis=-1, keepdims=True), 1e-24))

    # Similarity; the 20x scale is folded into txt: s == 20 * <y/||y||, txt>.
    s = jnp.dot(y.astype(jnp.bfloat16), txt_ref[...],
                preferred_element_type=jnp.float32) * inv
    t_pad = s.shape[-1]
    s = s.reshape(tb, p_pad, t_pad)            # layout-free: p_pad % 8 == 0

    if p_pad != p:
        # Mask the zero-padded patch rows out of the softmax over patches:
        # a single select; exp(-1e30 - m) underflows to exactly 0, so the
        # padded rows vanish from both num and den.
        pid = jax.lax.broadcasted_iota(jnp.int32, (1, p_pad, 1), 1)
        s = jnp.where(pid < p, s, -1e30)

    m = jnp.max(s, axis=1, keepdims=True)
    e = jnp.exp(s - m)
    num = jnp.sum(e * s, axis=1)               # [tb, T_pad]
    den = jnp.sum(e, axis=1)                   # [tb, T_pad], >= 1 always
    o_ref[...] = 5.0 * num / den               # exact divide (torch parity)


def fused_unmix_logits(patches, w_img, b_img, txt_proj, *, target_rows=1024):
    """patches [B,P,D], w_img [D,C], b_img [C], txt_proj [T,C] -> logits [B,T]."""
    B, P, D = patches.shape
    T, C = txt_proj.shape
    assert w_img.shape == (D, C)

    p_pad = _round_up(P, 8)       # sublane-align patches (layout-free reshape)
    t_pad = _round_up(T, 128)     # lane-dense logits store (no masked vst)
    tb = _choose_tb(B, p_pad, target_rows)
    b_pad = _round_up(B, tb)

    # bf16 streamed operand: halves the dominant HBM traffic; f32 accumulation
    # happens inside the kernel.
    x = patches.astype(jnp.bfloat16)
    if (b_pad, p_pad) != (B, P):
        x = jnp.pad(x, ((0, b_pad - B), (0, p_pad - P), (0, 0)))
    # x stays 3-D; the [tb, p_pad, D] -> [tb*p_pad, D] reshape is done in-kernel
    # (layout-free), avoiding a host-side reshape copy of the patches tensor.

    w = w_img.astype(jnp.bfloat16)
    b = b_img.reshape(1, C).astype(jnp.float32)
    # Fold 20x into the tiny resident text operand; pre-transpose to [C, T_pad]
    # so the kernel runs a plain NN matmul.
    txt_t = jnp.pad(20.0 * txt_proj, ((0, t_pad - T), (0, 0))).T.astype(jnp.bfloat16)

    kernel = functools.partial(_fused_unmix_kernel, tb=tb, p_pad=p_pad, p=P)
    logits = pl.pallas_call(
        kernel,
        out_shape=jax.ShapeDtypeStruct((b_pad, t_pad), jnp.float32),
        grid_spec=pltpu.PrefetchScalarGridSpec(
            num_scalar_prefetch=0,
            grid=(b_pad // tb,),
            in_specs=[
                pl.BlockSpec((tb, p_pad, D), lambda i: (i, 0, 0)),
                pl.BlockSpec((D, C), lambda i: (0, 0)),
                pl.BlockSpec((1, C), lambda i: (0, 0)),
                pl.BlockSpec((C, t_pad), lambda i: (0, 0)),
            ],
            out_specs=pl.BlockSpec((tb, t_pad), lambda i: (i, 0)),
        ),
        compiler_params=pltpu.CompilerParams(
            dimension_semantics=("parallel",),     # megacore-shardable on v7x
            vmem_limit_bytes=48 * 1024 * 1024,     # <= v7x's 64 MiB/TC; ample here
        ),
    )(x, w, b, txt_t)
    return logits[:B, :T]


# -------------------- Frozen-backbone stubs (plain JAX glue) ------------------
def stub_image_patches(images, patch, w_patch):
    # TODO(synk): frozen CLIP modified-ResNet visual backbone (conv1..layer4 +
    # attnpool c_proj) not reproduced; replaced by deterministic patchify+linear.
    B, Cc, H, W = images.shape
    x = images.reshape(B, Cc, H // patch, patch, W // patch, patch)
    x = x.transpose(0, 2, 4, 1, 3, 5).reshape(
        B, (H // patch) * (W // patch), Cc * patch * patch)
    return x @ w_patch  # [B, P, D]


def stub_text_features(tokens, emb_table):
    # TODO(synk): frozen CLIP text transformer (encode_text) not reproduced;
    # replaced by deterministic embedding lookup + mean pool.
    return jnp.mean(emb_table[tokens], axis=1)  # [2N, Dt]


# --------------------------------- forward -----------------------------------
def unmix_clip_forward(images, text_tokens, params, *, patch, N, target_rows=1024):
    patches = stub_image_patches(images, patch, params["w_patch"])    # [B, P, D]
    txt_feat = stub_text_features(text_tokens, params["emb_table"])   # [2N, Dt]

    # Text projector: tiny ([2N, Dt] @ [Dt, C]) -> plain XLA (a separate
    # pallas_call costs more in launch/DMA than the matmul itself).
    tp = txt_feat @ params["w_txt"] + params["b_txt"]
    txt_proj = tp / jnp.maximum(
        jnp.linalg.norm(tp, axis=-1, keepdims=True), 1e-12)           # [2N, C]

    # Fused Pallas hot path: image projection + normalize + similarity +
    # softmax-pool, without materializing img_proj [B, P, C] in HBM.
    logits = fused_unmix_logits(
        patches, params["w_img"], params["b_img"], txt_proj,
        target_rows=target_rows)                                      # [B, 2N]

    logits_pos = logits[:, :N]   # == logits.view(B, 2, N)[:, 0]
    logits_neg = logits[:, N:]   # == logits.view(B, 2, N)[:, 1]
    return logits_pos, logits_neg, txt_proj


# ----------------------------- pure-JAX reference -----------------------------
def _reference(images, text_tokens, params, *, patch, N):
    """All-f32 reference with the exact PyTorch-module semantics."""
    patches = stub_image_patches(images, patch, params["w_patch"])
    txt_feat = stub_text_features(text_tokens, params["emb_table"])
    ip = patches @ params["w_img"] + params["b_img"]
    ip = ip / jnp.maximum(jnp.linalg.norm(ip, axis=-1, keepdims=True), 1e-12)
    tp = txt_feat @ params["w_txt"] + params["b_txt"]
    tp = tp / jnp.maximum(jnp.linalg.norm(tp, axis=-1, keepdims=True), 1e-12)
    O = 20.0 * jnp.einsum("bpc,tc->btp", ip, tp)
    W = jax.nn.softmax(O, axis=-1)
    logits = 5.0 * jnp.sum(W * O, axis=-1)
    return logits[:, :N], logits[:, N:], tp


# ----------------------------------- test -------------------------------------
def _run_case(key, *, B, H, W, patch, D, Dt, C, N, seq, vocab):
    T = 2 * N
    ks = jax.random.split(key, 8)
    images = jax.random.normal(ks[0], (B, 3, H, W), jnp.float32)
    text_tokens = jax.random.randint(ks[1], (T, seq), 0, vocab)
    params = {
        # frozen-backbone stub params
        "w_patch": 0.02 * jax.random.normal(ks[2], (3 * patch * patch, D), jnp.float32),
        "emb_table": 0.02 * jax.random.normal(ks[3], (vocab, Dt), jnp.float32),
        # image / text projectors (single Linear D->C each)
        "w_img": jax.random.normal(ks[4], (D, C), jnp.float32) / np.sqrt(D),
        "b_img": 0.01 * jax.random.normal(ks[5], (C,), jnp.float32),
        "w_txt": jax.random.normal(ks[6], (Dt, C), jnp.float32) / np.sqrt(Dt),
        "b_txt": 0.01 * jax.random.normal(ks[7], (C,), jnp.float32),
    }

    out = unmix_clip_forward(images, text_tokens, params, patch=patch, N=N)
    jax.block_until_ready(out)
    logits_pos, logits_neg, txt_proj = out

    ref_pos, ref_neg, ref_txt = _reference(
        images, text_tokens, params, patch=patch, N=N)

    # The kernel feeds both MXU matmuls with bf16 operands (f32 accumulation)
    # per the perf review; the 20x scale + exp inside the softmax pool amplify
    # that quantization, so parity vs. the all-f32 reference is checked at a
    # correspondingly loosened tolerance (the norm/softmax epilogue itself is
    # exact f32: rsqrt + exact divide).
    np.testing.assert_allclose(np.asarray(logits_pos), np.asarray(ref_pos),
                               rtol=4e-2, atol=1e-1)
    np.testing.assert_allclose(np.asarray(logits_neg), np.asarray(ref_neg),
                               rtol=4e-2, atol=1e-1)
    # txt_proj is computed in plain f32 XLA on both sides -> tight check.
    np.testing.assert_allclose(np.asarray(txt_proj), np.asarray(ref_txt),
                               rtol=1e-5, atol=1e-5)
    assert logits_pos.shape == (B, N) and logits_neg.shape == (B, N)
    assert txt_proj.shape == (T, C)


if __name__ == "__main__":
    key = jax.random.PRNGKey(0)
    k1, k2 = jax.random.split(key)
    # Case 1: aligned shapes (P = 16, a multiple of 8).
    _run_case(k1, B=2, H=16, W=16, patch=4, D=32, Dt=32, C=128, N=4,
              seq=8, vocab=64)
    # Case 2: ragged shapes (P = 9, like CLIP's P = 49) -- exercises the
    # in-kernel patch-padding mask and the lane-padding of the 2N logits axis.
    _run_case(k2, B=3, H=12, W=12, patch=4, D=32, Dt=32, C=128, N=3,
              seq=8, vocab=64)
    print("KERNEL_OK")
</pallas_src>

<mosaic_0001>
module attributes {stable_mosaic.version = 11 : i64} {
  func.func @_fused_unmix_kernel(%arg0: i32, %arg1: memref<2x16x32xbf16, #tpu.memory_space<vmem>>, %arg2: memref<32x128xbf16, #tpu.memory_space<vmem>>, %arg3: memref<1x128xf32, #tpu.memory_space<vmem>>, %arg4: memref<128x128xbf16, #tpu.memory_space<vmem>>, %arg5: memref<2x128xf32, #tpu.memory_space<vmem>>) attributes {dimension_semantics = [#tpu.dimension_semantics<parallel>], iteration_bounds = array<i64: 1>, scalar_prefetch = 0 : i64, scratch_operands = 0 : i64, tpu.core_type = #tpu.core_type<tc>, window_params = [{transform_indices = @transform_0, window_bounds = array<i64: 2, 16, 32>}, {pipeline_mode = #tpu.pipeline_mode<synchronous>, transform_indices = @transform_1, window_bounds = array<i64: 32, 128>}, {pipeline_mode = #tpu.pipeline_mode<synchronous>, transform_indices = @transform_2, window_bounds = array<i64: 1, 128>}, {pipeline_mode = #tpu.pipeline_mode<synchronous>, transform_indices = @transform_3, window_bounds = array<i64: 128, 128>}, {transform_indices = @transform_4, window_bounds = array<i64: 2, 128>}]} {
    %c0 = arith.constant 0 : index
    %c0_0 = arith.constant 0 : index
    %c0_1 = arith.constant 0 : index
    %0 = vector.load %arg1[%c0, %c0_0, %c0_1] : memref<2x16x32xbf16, #tpu.memory_space<vmem>>, vector<2x16x32xbf16>
    %1 = vector.shape_cast %0 : vector<2x16x32xbf16> to vector<32x32xbf16>
    %c0_2 = arith.constant 0 : index
    %c0_3 = arith.constant 0 : index
    %2 = vector.load %arg2[%c0_2, %c0_3] : memref<32x128xbf16, #tpu.memory_space<vmem>>, vector<32x128xbf16>
    %cst = arith.constant dense<0.000000e+00> : vector<32x128xf32>
    %3 = tpu.matmul %1, %2, %cst {dimension_numbers = #tpu.dot_dimension_numbers<[1], [0], [0], [1], [0, 0, 1, 1], [], []>} : vector<32x32xbf16>, vector<32x128xbf16>, vector<32x128xf32> -> vector<32x128xf32>
    %c0_4 = arith.constant 0 : index
    %c0_5 = arith.constant 0 : index
    %4 = vector.load %arg3[%c0_4, %c0_5] : memref<1x128xf32, #tpu.memory_space<vmem>>, vector<1x128xf32>
    %5 = vector.broadcast %4 : vector<1x128xf32> to vector<32x128xf32>
    %6 = arith.addf %3, %5 : vector<32x128xf32>
    %7 = arith.mulf %6, %6 : vector<32x128xf32>
    %cst_6 = arith.constant dense<0.000000e+00> : vector<32xf32>
    %8 = vector.multi_reduction <add>, %7, %cst_6 [1] : vector<32x128xf32> to vector<32xf32>
    %9 = vector.shape_cast %8 : vector<32xf32> to vector<32x1xf32>
    %cst_7 = arith.constant 1.000000e-24 : f32
    %10 = vector.broadcast %cst_7 : f32 to vector<32x1xf32>
    %11 = arith.maximumf %9, %10 : vector<32x1xf32>
    %12 = math.rsqrt %11 : vector<32x1xf32>
    %13 = arith.truncf %6 : vector<32x128xf32> to vector<32x128xbf16>
    %c0_8 = arith.constant 0 : index
    %c0_9 = arith.constant 0 : index
    %14 = vector.load %arg4[%c0_8, %c0_9] : memref<128x128xbf16, #tpu.memory_space<vmem>>, vector<128x128xbf16>
    %cst_10 = arith.constant dense<0.000000e+00> : vector<32x128xf32>
    %15 = tpu.matmul %13, %14, %cst_10 {dimension_numbers = #tpu.dot_dimension_numbers<[1], [0], [0], [1], [0, 0, 1, 1], [], []>} : vector<32x128xbf16>, vector<128x128xbf16>, vector<32x128xf32> -> vector<32x128xf32>
    %16 = vector.broadcast %12 : vector<32x1xf32> to vector<32x128xf32>
    %17 = arith.mulf %15, %16 : vector<32x128xf32>
    %18 = vector.shape_cast %17 : vector<32x128xf32> to vector<2x16x128xf32>
    %cst_11 = arith.constant dense<0xFF800000> : vector<2x128xf32>
    %19 = vector.multi_reduction <maximumf>, %18, %cst_11 [1] : vector<2x16x128xf32> to vector<2x128xf32>
    %20 = vector.shape_cast %19 : vector<2x128xf32> to vector<2x1x128xf32>
    %21 = vector.broadcast %20 : vector<2x1x128xf32> to vector<2x16x128xf32>
    %22 = arith.subf %18, %21 : vector<2x16x128xf32>
    %23 = math.exp %22 : vector<2x16x128xf32>
    %24 = arith.mulf %23, %18 : vector<2x16x128xf32>
    %cst_12 = arith.constant dense<0.000000e+00> : vector<2x128xf32>
    %25 = vector.multi_reduction <add>, %24, %cst_12 [1] : vector<2x16x128xf32> to vector<2x128xf32>
    %cst_13 = arith.constant dense<0.000000e+00> : vector<2x128xf32>
    %26 = vector.multi_reduction <add>, %23, %cst_13 [1] : vector<2x16x128xf32> to vector<2x128xf32>
    %cst_14 = arith.constant 5.000000e+00 : f32
    %27 = vector.broadcast %cst_14 : f32 to vector<2x128xf32>
    %28 = arith.mulf %27, %25 : vector<2x128xf32>
    %29 = arith.divf %28, %26 : vector<2x128xf32>
    %c0_15 = arith.constant 0 : index
    %c0_16 = arith.constant 0 : index
    %30 = vector.load %arg5[%c0_15, %c0_16] : memref<2x128xf32, #tpu.memory_space<vmem>>, vector<2x128xf32>
    tpu.vector_store %arg5[%c0_15, %c0_16], %29 {strides = array<i32>} : memref<2x128xf32, #tpu.memory_space<vmem>>, vector<2x128xf32>,
    return
  }
  func.func @transform_0(%arg0: i32) -> (i32, i32, i32) {
    %c0_i32 = arith.constant 0 : i32
    %c0_i32_0 = arith.constant 0 : i32
    %c0_i32_1 = arith.constant 0 : i32
    return %arg0, %c0_i32, %c0_i32_0 : i32, i32, i32
  }
  func.func @transform_1(%arg0: i32) -> (i32, i32) {
    %c0_i32 = arith.constant 0 : i32
    %c0_i32_0 = arith.constant 0 : i32
    %c0_i32_1 = arith.constant 0 : i32
    return %c0_i32, %c0_i32_0 : i32, i32
  }
  func.func @transform_2(%arg0: i32) -> (i32, i32) {
    %c0_i32 = arith.constant 0 : i32
    %c0_i32_0 = arith.constant 0 : i32
    %c0_i32_1 = arith.constant 0 : i32
    return %c0_i32, %c0_i32_0 : i32, i32
  }
  func.func @transform_3(%arg0: i32) -> (i32, i32) {
    %c0_i32 = arith.constant 0 : i32
    %c0_i32_0 = arith.constant 0 : i32
    %c0_i32_1 = arith.constant 0 : i32
    return %c0_i32, %c0_i32_0 : i32, i32
  }
  func.func @transform_4(%arg0: i32) -> (i32, i32) {
    %c0_i32 = arith.constant 0 : i32
    %c0_i32_0 = arith.constant 0 : i32
    return %arg0, %c0_i32 : i32, i32
  }
}

</mosaic_0001>

<bundles_post_ra>
// kernel: tpu_custom_call.1
= control target key start
LH: loop header
LB: loop body
LE: loop exit
PB: predicated region body
PF: predicated region fallthrough
CT: control target
= control target key end

     0   :  { %9 = vsyncpa [#allocation3], 0  ;;  %s630_s0 = inlined_call_operand.hbm [shape: bf16[2,16,32], index: 0, kind: input, shape index: {}]   ;;  %s631_s1 = inlined_call_operand.hbm [shape: bf16[32,128], index: 1, kind: input, shape index: {}]   ;;  %s632_s2 = inlined_call_operand.vmem [shape: f32[1,128], index: 2, kind: input, shape index: {}]   ;;  %s633_s3 = inlined_call_operand.hbm [shape: bf16[128,128], index: 3, kind: input, shape index: {}]   ;;  %s634_s4 = inlined_call_operand.hbm [shape: f32[2,128], index: 4, kind: output, shape index: {}]  }
   0x1   :  { %10 = vsyncpa [#allocation6], 0 }
   0x2   :  { %11 = vsyncpa [#allocation4], 0  ;;  %s29_s17 = sshll.u32 %s631_s1, 4  ;;  %s584_s18 = smov [#allocation5]   ;;  %s30_s17 = int_to_ptr.hbm [resolvable:$true] %s29_s17 }
   0x3   :  { %s31_s19 = sshll.u32 %s584_s18, 4  ;;  %s16_s22 = sshll.u32 %s630_s0, 4  ;;  %s32_s19 = int_to_ptr.vmem [resolvable:$true] %s31_s19  ;;  %s17_s22 = int_to_ptr.hbm [resolvable:$true] %s16_s22 }
   0x4   :  { %s585_s23 = smov 64   ;;  %s586_s24 = smov 4  }
   0x5   :  { %37 = dma.hbm_to_vmem [thread:$0]  %s30_s17, 256, %s32_s19, [#allocation6], %s585_s23, %s585_s23, %s586_s24  }
   0x6   :  { %s587_s25 = smov [#allocation2]   ;;  %s44_s29 = sshll.u32 %s633_s3, 4  ;;  %s45_s29 = int_to_ptr.hbm [resolvable:$true] %s44_s29 }
   0x7   :  { %s18_s26 = sshll.u32 %s587_s25, 4  ;;  %s588_s1 = smov [#allocation7]   ;;  %s19_s26 = int_to_ptr.vmem [resolvable:$true] %s18_s26 }
   0x8   :  { %24 = dma.hbm_to_vmem [thread:$0]  %s17_s22, 256, %s19_s26, [#allocation3], %s585_s23, %s585_s23, %s586_s24  }
   0x9   :  { %s46_s30 = sshll.u32 %s588_s1, 4  ;;  %s47_s30 = int_to_ptr.vmem [resolvable:$true] %s46_s30 }
   0xa   :  { %52 = dma.hbm_to_vmem [thread:$0]  %s45_s29, 1024, %s47_s30, [#allocation6], %s585_s23, %s585_s23, %s586_s24  }
   0xb   :  { %578 = dma.done.wait [#allocation3], 256  }
   0xc   :  { %579 = vsyncadd [#allocation3], 4294967040 }
   0xd   :  { %580 = dma.done.wait [#allocation6], 1280  }
   0xe   :  { %581 = vsyncadd [#allocation6], 4294966016  ;;  %v438_v0 = vld [vmem:[#allocation5 + $0x8] sm:$0xff]  ;;  %v437_v2 = vld [vmem:[#allocation5] sm:$0xff]  ;;  %vm100_vm0 = vcmask 261120   ;;  %s374_s8 = sshll.u32 %s634_s4, 4  ;;  %s375_s8 = int_to_ptr.hbm [resolvable:$true] %s374_s8 }
   0xf   :  { %v446_v1 = vld [vmem:[#allocation7 + $0x38] sm:$0xff]  ;;  %113 = vmatpush.bf16.msra.mxu0 %v438_v0  ;;  %v445_v3 = vld [vmem:[#allocation7 + $0x30] sm:$0xff]  ;;  %v435_v4 = vld [vmem:[#allocation2] sm:$0xff] }
  0x10   :  { %248 = vmatpush.bf16.msra.mxu1 %v446_v1  ;;  %447 = vmatpush.bf16.msra.mxu2 %v446_v1  ;;  %v444_v5 = vld [vmem:[#allocation7 + $0x28] sm:$0xff]  ;;  %v443_v6 = vld [vmem:[#allocation7 + $0x20] sm:$0xff]  ;;  %v442_v7 = vld [vmem:[#allocation7 + $0x18] sm:$0xff] }
  0x11   :  { %v436_v8 = vld [vmem:[#allocation2 + $0x8] sm:$0xff]  ;;  %v441_v9 = vld [vmem:[#allocation7 + $0x10] sm:$0xff]  ;;  %v439_v11 = vld [vmem:[#allocation7] sm:$0xff] }
  0x12   :  { %v440_v10 = vld [vmem:[#allocation7 + $0x8] sm:$0xff]  ;;  %v461_v12 = vld [vmem:[%s632_s2] ss:$0 sm:$0xff]  ;;  %s589_s2 = smov [#allocation8]  }
  0x13   :  { %114 = vmatpush.bf16.msra.mxu0 %v437_v2  ;;  %s372_s5 = sshll.u32 %s589_s2, 4  ;;  %s373_s5 = int_to_ptr.vmem [resolvable:$true] %s372_s5 }
  0x14   :  { %249 = vmatpush.bf16.msra.mxu1 %v445_v3  ;;  %448 = vmatpush.bf16.msra.mxu2 %v445_v3 }
  0x16   :  { %401 = vmatmul.msk.bf16.vlgmr.msra.gmra.mxu0 %vm100_vm0, %v435_v4 }
  0x18   :  { %250 = vmatpush.bf16.msra.mxu1 %v444_v5  ;;  %449 = vmatpush.bf16.msra.mxu2 %v444_v5 }
  0x1c   :  { %251 = vmatpush.bf16.msra.mxu1 %v443_v6  ;;  %450 = vmatpush.bf16.msra.mxu2 %v443_v6 }
  0x20   :  { %252 = vmatpush.bf16.msra.mxu1 %v442_v7  ;;  %451 = vmatpush.bf16.msra.mxu2 %v442_v7 }
  0x24   :  { %253 = vmatpush.bf16.msra.mxu1 %v441_v9  ;;  %452 = vmatpush.bf16.msra.mxu2 %v441_v9 }
  0x26   :  { %402 = vmatmul.msk.bf16.gmra.mxu0 %vm100_vm0, %v436_v8 }
  0x28   :  { %254 = vmatpush.bf16.msra.mxu1 %v440_v10  ;;  %453 = vmatpush.bf16.msra.mxu2 %v440_v10 }
  0x2c   :  { %255 = vmatpush.bf16.msra.mxu1 %v439_v11  ;;  %454 = vmatpush.bf16.msra.mxu2 %v439_v11 }
  0x93   :  { %v116_v13 = vpop.f32.mrf.mxu0 }
  0x94   :  { %v117_v14 = vadd.f32 %v461_v12, %v116_v13 }
  0x96   :  { %v126_v15 = vmul.f32 %v117_v14, %v117_v14 }
  0x98   :  { %130 = vadd.xlane.f32.xlu0 %v126_v15 }
  0x9b   :  { %v118_v16 = vpop.f32.mrf.mxu0 }
  0x9c   :  { %v119_v17 = vadd.f32 %v461_v12, %v118_v16 }
  0x9e   :  { %v182_v18 = vpack.c.bf16 %v119_v17, %v117_v14  ;;  %v127_v19 = vmul.f32 %v119_v17, %v119_v17 }
  0xa0   :  { %256 = vmatmul.bf16.vlgmr.msra.gmra.mxu1 %v182_v18  ;;  %132 = vadd.xlane.f32.xlu0 %v127_v19 }
  0xa3   :  { %v121_v20 = vpop.f32.mrf.mxu0 }
  0xa4   :  { %v122_v21 = vadd.f32 %v461_v12, %v121_v20 }
  0xa6   :  { %v128_v22 = vmul.f32 %v122_v21, %v122_v21 }
  0xa8   :  { %134 = vadd.xlane.f32.xlu1 %v128_v22 }
  0xab   :  { %v123_v23 = vpop.f32.mrf.mxu0 }
  0xac   :  { %v124_v24 = vadd.f32 %v461_v12, %v123_v23 }
  0xae   :  { %v183_v25 = vpack.c.bf16 %v124_v24, %v122_v21  ;;  %v129_v26 = vmul.f32 %v124_v24, %v124_v24 }
  0xb0   :  { %261 = vmatmul.bf16.vlgmr.msra.gmra.mxu2 %v183_v25  ;;  %136 = vadd.xlane.f32.xlu1 %v129_v26 }
 0x10b   :  { %v131_v27 = vpop.xlane.xlu0 %130 }
 0x10c   :  { %v138_v28 = vmax.f32 %v131_v27, 1e-24 }
 0x10e   :  { %462 = vrsqrt.f32 %v138_v28  ;;  %vm148_vm2 = vweird.f32 %v138_v28 }
 0x113   :  { %v133_v29 = vpop.xlane.xlu0 %132 }
 0x114   :  { %v463_v30 = vpop.eup %462  ;;  %v139_v31 = vmax.f32 %v133_v29, 1e-24 }
 0x115   :  { %v143_v32 = vmul.f32 %v463_v30, %v138_v28  ;;  %vm149_vm1 = vweird.f32 %v463_v30 }
 0x116   :  { %464 = vrsqrt.f32 %v139_v31  ;;  %vm150_vm4 = vmor %vm148_vm2, %vm149_vm1  ;;  %vm158_vm5 = vweird.f32 %v139_v31 }
 0x117   :  { %v144_v33 = vmul.f32 %v463_v30, %v143_v32 }
 0x119   :  { %v145_v34 = vmul.f32 0.5, %v144_v33 }
 0x11b   :  { %v135_v35 = vpop.xlane.xlu1 %134  ;;  %v146_v39 = vsub.f32 1.5, %v145_v34 }
 0x11c   :  { %v465_v36 = vpop.eup %464  ;;  %v140_v37 = vmax.f32 %v135_v35, 1e-24 }
 0x11d   :  { %v153_v38 = vmul.f32 %v465_v36, %v139_v31  ;;  %v257_v40 = vpop.f32.mrf.mxu1  ;;  %v147_v43 = vmul.f32 %v463_v30, %v146_v39  ;;  %vm159_vm3 = vweird.f32 %v465_v36 }
 0x11e   :  { %466 = vrsqrt.f32 %v140_v37  ;;  %vm160_vm6 = vmor %vm158_vm5, %vm159_vm3  ;;  %vm168_vm9 = vweird.f32 %v140_v37  ;;  %vm363_vm5 = vcmask 1041409  }
 0x11f   :  { %v154_v41 = vmul.f32 %v465_v36, %v153_v38  ;;  %v151_v48 = vsel %vm150_vm4, %v463_v30, %v147_v43 }
 0x120   :  { %v267_v53 = vmul.f32 %v257_v40, %v151_v48 }
 0x121   :  { %v155_v42 = vmul.f32 0.5, %v154_v41 }
 0x123   :  { %v156_v44 = vsub.f32 1.5, %v155_v42  ;;  %v137_v45 = vpop.xlane.xlu1 %136 }
 0x124   :  { %v467_v46 = vpop.eup %466  ;;  %v141_v47 = vmax.f32 %v137_v45, 1e-24 }
 0x125   :  { %v157_v49 = vmul.f32 %v465_v36, %v156_v44  ;;  %v163_v50 = vmul.f32 %v467_v46, %v140_v37  ;;  %v259_v52 = vpop.f32.mrf.mxu1  ;;  %vm169_vm7 = vweird.f32 %v467_v46 }
 0x126   :  { %468 = vrsqrt.f32 %v141_v47  ;;  %vm178_vm10 = vweird.f32 %v141_v47  ;;  %vm170_vm11 = vmor %vm168_vm9, %vm169_vm7 }
 0x127   :  { %v161_v51 = vsel %vm160_vm6, %v465_v36, %v157_v49  ;;  %v164_v56 = vmul.f32 %v467_v46, %v163_v50 }
 0x128   :  { %v268_v54 = vmul.f32 %v259_v52, %v161_v51 }
 0x129   :  { %v165_v61 = vmul.f32 0.5, %v164_v56 }
 0x12a   :  { %v271_v55 = vmax.f32 %v267_v53, %v268_v54 }
 0x12b   :  { %v166_v3 = vsub.f32 1.5, %v165_v61 }
 0x12c   :  { %v469_v57 = vpop.eup %468  ;;  %v272_v58 = vrot.slane %v271_v55, 4 }
 0x12d   :  { %v173_v59 = vmul.f32 %v469_v57, %v141_v47  ;;  %v167_v7 = vmul.f32 %v467_v46, %v166_v3  ;;  %vm179_vm8 = vweird.f32 %v469_v57 }
 0x12e   :  { %v273_v60 = vmax.f32 %v271_v55, %v272_v58  ;;  %vm180_vm12 = vmor %vm178_vm10, %vm179_vm8 }
 0x12f   :  { %v174_v62 = vmul.f32 %v469_v57, %v173_v59  ;;  %v171_v13 = vsel %vm170_vm11, %v467_v46, %v167_v7 }
 0x130   :  { %v274_v63 = vrot.slane %v273_v60, 2 }
 0x131   :  { %v175_v0 = vmul.f32 0.5, %v174_v62 }
 0x132   :  { %v275_v1 = vmax.f32 %v273_v60, %v274_v63 }
 0x133   :  { %v176_v2 = vsub.f32 1.5, %v175_v0  ;;  %v262_v4 = vpop.f32.mrf.mxu2 }
 0x134   :  { %v276_v5 = vrot.slane %v275_v1, 1  ;;  %v269_v16 = vmul.f32 %v262_v4, %v171_v13 }
 0x135   :  { %v177_v8 = vmul.f32 %v469_v57, %v176_v2 }
 0x136   :  { %v277_v6 = vmax.f32 %v275_v1, %v276_v5 }
 0x137   :  { %v181_v14 = vsel %vm180_vm12, %v469_v57, %v177_v8 }
 0x138   :  { %v285_v9 = vsub.f32 %v267_v53, %v277_v6  ;;  %v286_v10 = vsub.f32 %v268_v54, %v277_v6 }
 0x13a   :  { %v289_v11 = vmul.f32 1.442695, %v285_v9  ;;  %v291_v12 = vmul.f32 1.442695, %v286_v10 }
 0x13b   :  { %v264_v15 = vpop.f32.mrf.mxu2 }
 0x13c   :  { %470 = vpow2.f32 %v289_v11  ;;  %v270_v17 = vmul.f32 %v264_v15, %v181_v14 }
 0x13d   :  { %472 = vpow2.f32 %v291_v12 }
 0x13e   :  { %v278_v18 = vmax.f32 %v269_v16, %v270_v17 }
 0x140   :  { %v279_v19 = vrot.slane %v278_v18, 4 }
 0x142   :  { %v471_v20 = vpop.eup %470  ;;  %v280_v21 = vmax.f32 %v278_v18, %v279_v19 }
 0x143   :  { %v473_v22 = vpop.eup %472  ;;  %v297_v38 = vmul.f32 %v471_v20, %v267_v53 }
 0x144   :  { %v315_v23 = vadd.f32 %v473_v22, %v471_v20  ;;  %v281_v24 = vrot.slane %v280_v21, 2  ;;  %v298_v39 = vmul.f32 %v473_v22, %v268_v54 }
 0x146   :  { %v316_v25 = vrot.slane %v315_v23, 4  ;;  %v282_v26 = vmax.f32 %v280_v21, %v281_v24  ;;  %v301_v43 = vadd.f32 %v298_v39, %v297_v38 }
 0x148   :  { %v317_v27 = vadd.f32 %v316_v25, %v315_v23  ;;  %v283_v28 = vrot.slane %v282_v26, 1  ;;  %v302_v48 = vrot.slane %v301_v43, 4 }
 0x14a   :  { %v318_v29 = vrot.slane %v317_v27, 2  ;;  %v284_v30 = vmax.f32 %v282_v26, %v283_v28  ;;  %v303_v55 = vadd.f32 %v302_v48, %v301_v43 }
 0x14c   :  { %v319_v31 = vadd.f32 %v318_v29, %v317_v27  ;;  %v287_v32 = vsub.f32 %v269_v16, %v284_v30  ;;  %v288_v33 = vsub.f32 %v270_v17, %v284_v30  ;;  %v304_v54 = vrot.slane %v303_v55, 2 }
 0x14e   :  { %v293_v34 = vmul.f32 1.442695, %v287_v32  ;;  %v295_v35 = vmul.f32 1.442695, %v288_v33  ;;  %v320_v36 = vrot.slane %v319_v31, 1  ;;  %v305_v62 = vadd.f32 %v304_v54, %v303_v55 }
 0x150   :  { %474 = vpow2.f32 %v293_v34  ;;  %v321_v37 = vadd.f32 %v320_v36, %v319_v31  ;;  %v306_v2 = vrot.slane %v305_v62, 1 }
 0x151   :  { %476 = vpow2.f32 %v295_v35 }
 0x152   :  { %478 = vrcp.f32 %v321_v37  ;;  %vm336_vm14 = vweird.f32 %v321_v37  ;;  %v342_v6 = vand.u32 2147483648, %v321_v37  ;;  %v340_v7 = vand.u32 2147483647, %v321_v37 }
 0x153   :  { %v307_v9 = vadd.f32 %v306_v2, %v305_v62 }
 0x154   :  { %v343_v15 = vor.u32 1.1754944e-38, %v342_v6  ;;  %vm341_vm1 = vcmp.eq.f32.partialorder %v340_v7, 8.507059e+37 }
 0x155   :  { %v329_v19 = vmul.f32 5.0, %v307_v9 }
 0x156   :  { %v475_v40 = vpop.eup %474 }
 0x157   :  { %v477_v41 = vpop.eup %476  ;;  %v299_v42 = vmul.f32 %v475_v40, %v269_v16 }
 0x158   :  { %v300_v44 = vmul.f32 %v477_v41, %v270_v17  ;;  %v322_v45 = vadd.f32 %v477_v41, %v475_v40  ;;  %v479_v50 = vpop.eup %478 }
 0x159   :  { %v332_v57 = vmul.f32 %v479_v50, %v321_v37  ;;  %vm337_vm13 = vweird.f32 %v479_v50 }
 0x15a   :  { %v308_v46 = vadd.f32 %v300_v44, %v299_v42  ;;  %v323_v47 = vrot.slane %v322_v45, 4  ;;  %vm338_vm15 = vmor %vm336_vm14, %vm337_vm13 }
 0x15b   :  { %v333_v60 = vsub.f32 1.0, %v332_v57 }
 0x15c   :  { %v324_v49 = vadd.f32 %v323_v47, %v322_v45  ;;  %v309_v51 = vrot.slane %v308_v46, 4 }
 0x15d   :  { %v334_v63 = vmul.f32 %v479_v50, %v333_v60 }
 0x15e   :  { %v325_v52 = vrot.slane %v324_v49, 2  ;;  %v310_v58 = vadd.f32 %v309_v51, %v308_v46 }
 0x15f   :  { %v335_v3 = vadd.f32 %v479_v50, %v334_v63 }
 0x160   :  { %v326_v56 = vadd.f32 %v325_v52, %v324_v49  ;;  %v311_v61 = vrot.slane %v310_v58, 2 }
 0x161   :  { %v339_v10 = vsel %vm338_vm15, %v479_v50, %v335_v3 }
 0x162   :  { %v327_v53 = vrot.slane %v326_v56, 1  ;;  %v312_v0 = vadd.f32 %v311_v61, %v310_v58  ;;  %v344_v17 = vsel %vm341_vm1, %v343_v15, %v339_v10 }
 0x163   :  { %v345_v23 = vmul.f32 %v344_v17, %v329_v19 }
 0x164   :  { %v328_v59 = vadd.f32 %v327_v53, %v326_v56  ;;  %v313_v4 = vrot.slane %v312_v0, 1 }
 0x166   :  { %480 = vrcp.f32 %v328_v59  ;;  %v357_v11 = vand.u32 2147483648, %v328_v59  ;;  %v314_v12 = vadd.f32 %v313_v4, %v312_v0  ;;  %v355_v14 = vand.u32 2147483647, %v328_v59 }
 0x167   :  { %vm351_vm2 = vweird.f32 %v328_v59 }
 0x168   :  { %v358_v18 = vor.u32 1.1754944e-38, %v357_v11  ;;  %v330_v20 = vmul.f32 5.0, %v314_v12  ;;  %vm356_vm4 = vcmp.eq.f32.partialorder %v355_v14, 8.507059e+37 }
 0x16c   :  { %v481_v1 = vpop.eup %480 }
 0x16d   :  { %v347_v5 = vmul.f32 %v481_v1, %v328_v59  ;;  %vm352_vm0 = vweird.f32 %v481_v1 }
 0x16e   :  { %vm353_vm3 = vmor %vm351_vm2, %vm352_vm0 }
 0x16f   :  { %v348_v8 = vsub.f32 1.0, %v347_v5 }
 0x171   :  { %v349_v13 = vmul.f32 %v481_v1, %v348_v8 }
 0x173   :  { %v350_v16 = vadd.f32 %v481_v1, %v349_v13 }
 0x175   :  { %v354_v21 = vsel %vm353_vm3, %v481_v1, %v350_v16 }
 0x176   :  { %v359_v22 = vsel %vm356_vm4, %v358_v18, %v354_v21 }
 0x177   :  { %v360_v24 = vmul.f32 %v359_v22, %v330_v20 }
 0x179   :  { %v364_v25 = vsel %vm363_vm5, %v360_v24, %v345_v23 }
 0x17a   :  { %366 = vst [vmem:[#allocation8] sm:$0x3] %v364_v25 }
 0x17b   :  { %377 = dma.vmem_to_hbm [thread:$0]  %s373_s5, 32, %s375_s8, [#allocation4]  }
 0x17c   :  { %582 = dma.done.wait [#allocation4], 32  }
 0x17d   :  { %583 = vsyncadd [#allocation4], 4294967264 }
 0x17e   :  { %382 = vsyncpa [#allocation3], 1 }
 0x17f   :  { %383 = vsyncpa [#allocation6], 1 }
 0x180   :  { %384 = vsyncpa [#allocation4], 1 }

</bundles_post_ra>
